<compile_context>
chip_gen: v5e
topology: v5e:2x2
jax: 0.10.0
libtpu: 0.0.40
codegen_flags: <defaults>
</compile_context>

<pallas_src>
import functools

import jax
import jax.numpy as jnp
from jax.experimental import pallas as pl
from jax.experimental.pallas import tpu as pltpu

_BN_EPS = 1e-5


def _activate(y, af):
    if af:  # nn.Hardswish: x * relu6(x + 3) / 6
        return y * jnp.clip(y + 3.0, 0.0, 6.0) * (1.0 / 6.0)
    return jnp.maximum(y, 0.0)  # nn.ReLU


def _fold_bn(bn_params):
    gamma, beta, mean, var = bn_params
    scale = gamma.astype(jnp.float32) / jnp.sqrt(var.astype(jnp.float32) + _BN_EPS)
    bias = beta.astype(jnp.float32) - mean.astype(jnp.float32) * scale
    return scale, bias


def _round_up(v, m):
    return (v + m - 1) // m * m


# ---------------- fused kernel ----------------

def _fused_block_kernel(*refs, has_expand, identity, af, K, stride,
                        Wp, Ho, Wo, E, p, compute_dtype):
    if has_expand:
        (x_ref, mask_ref, w1_ref, b1_ref, dw_ref, b2_ref, w3_ref, b3_ref,
         o_ref, xbuf_ref) = refs
    else:
        (x_ref, dw_ref, b2_ref, w3_ref, b3_ref, o_ref) = refs

    Mo = Ho * Wp
    x2 = x_ref[0]  # (Cin, L): padded (and, for stride 2, de-interleaved) flat image

    # ---- expand: 1x1 conv (BN scale folded into w1) + bias + activation (MXU) ----
    if has_expand:
        y1 = jnp.dot(w1_ref[...], x2.astype(compute_dtype),
                     preferred_element_type=jnp.float32)
        # mask re-zeroes the padding halo (act(0 + bias) != 0); one VALU pass replaces
        # the full-buffer memset + per-row scatter of the previous version.
        y1 = _activate(y1 + b1_ref[...], af) * mask_ref[0]
        xbuf_ref[...] = y1                     # single full-width scratch store

        def window(off):
            return xbuf_ref[:, off:off + Mo]
    else:
        # no expand: the (already zero-padded) input feeds the depthwise directly
        def window(off):
            return x2[:, off:off + Mo]

    # ---- depthwise KxK conv + bias + activation (VPU, f32) ----
    dw = dw_ref[...]                           # (Cm, K*K), BN scale folded in
    acc = jnp.zeros((dw.shape[0], Mo), jnp.float32)
    # kw outer so that when Wp is 128-aligned the lane phase is constant over kh.
    for kw in range(K):
        for kh in range(K):
            base = kh * Wp + kw
            if stride == 1:
                off = base                     # contiguous shifted read
            else:  # stride == 2: flat-parity de-interleaved layout -> contiguous read
                off = base // 2 + (E if (base % 2) else 0)
            acc = acc + window(off) * dw[:, kh * K + kw:kh * K + kw + 1]
    y2 = _activate(acc + b2_ref[...], af)

    # ---- pointwise 1x1 conv + BN bias (+ fused residual) (MXU) ----
    # full padded-width matmul; garbage columns are discarded by the row stores below.
    out = jnp.dot(w3_ref[...], y2.astype(compute_dtype),
                  preferred_element_type=jnp.float32)
    out = out + b3_ref[...]
    if identity:
        # identity => stride == 1 (module invariant): the residual is the padded-input
        # interior, which is the same flat layout shifted by p rows + p columns.
        out = out + x2[:, p * Wp + p: p * Wp + p + Mo]

    # per-output-row stores of the valid Wo columns (Cout rows each)
    for ho in range(Ho):
        o_ref[0, :, ho * Wo:(ho + 1) * Wo] = (
            out[:, ho * Wp: ho * Wp + Wo].astype(o_ref.dtype))


# ---------------- wrapper ----------------

def inverted_res_block(x_nchw, params, *, kernel_size, stride, SE, AF,
                       compute_dtype=jnp.bfloat16):
    # TODO(synk): SE_block is referenced but not defined in the provided module source,
    # so only SE=False is implemented.
    assert not SE, "SE_block source not provided"
    assert stride in (1, 2), "MobileNetV3 uses stride 1 or 2"

    N, Cin, H, W = x_nchw.shape
    Cm = params["dw_w"].shape[0]
    Cout = params["pw_w"].shape[0]
    K = kernel_size
    p = (K - 1) // 2
    Ho = (H + 2 * p - K) // stride + 1
    Wo = (W + 2 * p - K) // stride + 1

    has_expand = Cin < Cm
    if not has_expand:
        assert Cin == Cm, "depthwise expects inner_channels inputs"
    identity = (stride == 1) and (Cin == Cout)
    # NOTE: match_dim/match_bn in the PyTorch module are unreachable (identity already
    # requires stride==1 and Cin==Cout) -> plain residual add.

    # ---- padded / (for stride 2) de-interleaved flat geometry --------------------
    Wp = W + 2 * p
    Wp_aligned = _round_up(Wp, 128)
    if Wp_aligned <= Wp + Wp // 4:
        # wide images: 128-align the row stride so kh offsets are vreg-aligned and only
        # kw contributes a lane rotate (review opt 3); skipped for small W where the
        # inflation would dominate VALU work.
        Wp = Wp_aligned
    Hp = H + 2 * p
    Mo = Ho * Wp                               # depthwise output in padded-width coords
    base_max = (K - 1) * (Wp + 1)
    L = max(base_max + stride * (Mo - 1) + 1, Hp * Wp)
    L = _round_up(L, 128)                      # even + lane-dense
    E = L // 2                                 # even-phase offset (stride-2 layout)
    HoWo = Ho * Wo

    def prep(img):   # (n, c, H, W) f32 -> (n, c, L) with zero halo / zero slack
        n, c = img.shape[:2]
        xp = jnp.pad(img, ((0, 0), (0, 0), (p, p), (p, Wp - W - p)))
        xf = xp.reshape(n, c, Hp * Wp)
        xf = jnp.pad(xf, ((0, 0), (0, 0), (0, L - Hp * Wp)))
        if stride == 2:
            # flat-parity de-interleave: every tap read becomes contiguous in-kernel
            xf = jnp.concatenate([xf[..., 0::2], xf[..., 1::2]], axis=-1)
        return xf

    x = prep(x_nchw.astype(jnp.float32))

    # ---- fold BN in f32, then cast MXU weights to the compute dtype --------------
    s2, b2 = _fold_bn(params["dw_bn"])
    dwf = params["dw_w"].reshape(Cm, K * K).astype(jnp.float32) * s2[:, None]
    s3, b3 = _fold_bn(params["pw_bn"])
    w3f = (params["pw_w"].reshape(Cout, Cm).astype(jnp.float32)
           * s3[:, None]).astype(compute_dtype)

    cbytes = jnp.dtype(compute_dtype).itemsize
    args = [x]
    in_specs = [pl.BlockSpec((1, Cin, L), lambda n: (n, 0, 0))]
    flops = 2 * Mo * K * K * Cm + 2 * Mo * Cm * Cout
    weight_bytes = (Cm * K * K + 2 * Cm + Cout) * 4 + Cout * Cm * cbytes
    if has_expand:
        mask = prep(jnp.ones((1, 1, H, W), jnp.float32))
        s1, b1 = _fold_bn(params["exp_bn"])
        w1f = (params["exp_w"].reshape(Cm, Cin).astype(jnp.float32)
               * s1[:, None]).astype(compute_dtype)
        args += [mask, w1f, b1[:, None]]
        in_specs += [pl.BlockSpec((1, 1, L), lambda n: (0, 0, 0)),
                     pl.BlockSpec((Cm, Cin), lambda n: (0, 0)),
                     pl.BlockSpec((Cm, 1), lambda n: (0, 0))]
        flops += 2 * L * Cin * Cm
        weight_bytes += Cm * Cin * cbytes + Cm * 4 + L * 4
    args += [dwf, b2[:, None], w3f, b3[:, None]]
    in_specs += [pl.BlockSpec((Cm, K * K), lambda n: (0, 0)),
                 pl.BlockSpec((Cm, 1), lambda n: (0, 0)),
                 pl.BlockSpec((Cout, Cm), lambda n: (0, 0)),
                 pl.BlockSpec((Cout, 1), lambda n: (0, 0))]
    flops *= N
    bytes_accessed = 4 * (N * Cin * L + N * Cout * HoWo) + weight_bytes

    scratch_shapes = []
    if has_expand:
        # TODO(synk): bf16 scratch on v6e/v7x (halves VMEM + depthwise vld traffic);
        # kept f32 so the VPU path stays native on v5e.
        scratch_shapes.append(pltpu.VMEM((Cm, L), jnp.float32))

    # per-step VMEM footprint (double-buffered I/O blocks + weights + scratch + live
    # temporaries) -> vmem_limit_bytes (review opt 7)
    est = 2 * Cin * L * 4 + 2 * Cout * HoWo * 4 + 2 * weight_bytes
    est += Cm * L * 4 if has_expand else 0
    est += Cm * Mo * (4 + cbytes) + Cout * Mo * 4 + Cin * L * 4
    vmem_limit = int(min(max(2 * est + (8 << 20), 32 << 20), 128 << 20))

    kernel = functools.partial(
        _fused_block_kernel, has_expand=has_expand, identity=identity, af=AF,
        K=K, stride=stride, Wp=Wp, Ho=Ho, Wo=Wo, E=E, p=p,
        compute_dtype=compute_dtype)

    out = pl.pallas_call(
        kernel,
        out_shape=jax.ShapeDtypeStruct((N, Cout, HoWo), jnp.float32),
        grid_spec=pltpu.PrefetchScalarGridSpec(
            num_scalar_prefetch=0,
            grid=(N,),
            in_specs=in_specs,
            out_specs=pl.BlockSpec((1, Cout, HoWo), lambda n: (n, 0, 0)),
            scratch_shapes=scratch_shapes),
        compiler_params=pltpu.CompilerParams(
            # TODO(synk): add an H-tile "parallel" axis ((K-1)-row halo) so v7x's two
            # TensorCores are used at batch 1 and per-step VMEM shrinks further.
            dimension_semantics=("parallel",),
            vmem_limit_bytes=vmem_limit),
        cost_estimate=pl.CostEstimate(flops=int(flops), transcendentals=0,
                                      bytes_accessed=int(bytes_accessed)),
    )(*args)

    return out.reshape(N, Cout, Ho, Wo)


# ---------------- pure-JAX reference (for verification) ----------------

def ref_forward(x, params, *, kernel_size, stride, SE, AF):
    del SE
    hp = jax.lax.Precision.HIGHEST

    def bn(y, bnp):
        g, b, m, v = bnp
        s = g / jnp.sqrt(v + _BN_EPS)
        return (y - m[None, :, None, None]) * s[None, :, None, None] + b[None, :, None, None]

    Cin = x.shape[1]
    Cm = params["dw_w"].shape[0]
    Cout = params["pw_w"].shape[0]
    dn = ("NCHW", "OIHW", "NCHW")
    y = x
    if Cin < Cm:
        y = jax.lax.conv_general_dilated(y, params["exp_w"], (1, 1), "VALID",
                                         dimension_numbers=dn, precision=hp)
        y = _activate(bn(y, params["exp_bn"]), AF)
    p = (kernel_size - 1) // 2
    y = jax.lax.conv_general_dilated(y, params["dw_w"], (stride, stride),
                                     [(p, p), (p, p)], dimension_numbers=dn,
                                     feature_group_count=Cm, precision=hp)
    y = _activate(bn(y, params["dw_bn"]), AF)
    y = jax.lax.conv_general_dilated(y, params["pw_w"], (1, 1), "VALID",
                                     dimension_numbers=dn, precision=hp)
    y = bn(y, params["pw_bn"])
    if stride == 1 and Cin == Cout:
        y = y + x
    return y


if __name__ == "__main__":
    key = jax.random.PRNGKey(0)

    def bn_params(k, c):
        k1, k2, k3, k4 = jax.random.split(k, 4)
        gamma = jax.random.uniform(k1, (c,), jnp.float32, 0.5, 1.5)
        beta = 0.1 * jax.random.normal(k2, (c,), jnp.float32)
        mean = 0.1 * jax.random.normal(k3, (c,), jnp.float32)
        var = jax.random.uniform(k4, (c,), jnp.float32, 0.5, 1.5)
        return (gamma, beta, mean, var)

    def make_case(k, N, Cin, Cm, Cout, H, W, K):
        ks = jax.random.split(k, 7)
        params = {
            "exp_w": 0.3 * jax.random.normal(ks[0], (Cm, Cin, 1, 1), jnp.float32),
            "exp_bn": bn_params(ks[1], Cm),
            "dw_w": 0.3 * jax.random.normal(ks[2], (Cm, 1, K, K), jnp.float32),
            "dw_bn": bn_params(ks[3], Cm),
            "pw_w": 0.3 * jax.random.normal(ks[4], (Cout, Cm, 1, 1), jnp.float32),
            "pw_bn": bn_params(ks[5], Cout),
        }
        x = jax.random.normal(ks[6], (N, Cin, H, W), jnp.float32)
        return x, params

    def check(x, params, K, stride, AF, compute_dtype, tol, name):
        ref = ref_forward(x, params, kernel_size=K, stride=stride, SE=False, AF=AF)
        out = inverted_res_block(x, params, kernel_size=K, stride=stride, SE=False,
                                 AF=AF, compute_dtype=compute_dtype)
        out = jax.block_until_ready(out)
        assert out.shape == ref.shape, (name, out.shape, ref.shape)
        err = float(jnp.max(jnp.abs(out - ref)))
        assert jnp.allclose(out, ref, atol=tol, rtol=tol), f"{name} max_err={err}"

    k1, k2, k3 = jax.random.split(key, 3)

    # 1) expand + stride 1 + hardswish + residual (exact f32 path + bf16 MXU path)
    x, prm = make_case(k1, N=2, Cin=8, Cm=16, Cout=8, H=16, W=16, K=3)
    check(x, prm, K=3, stride=1, AF=True, compute_dtype=jnp.float32, tol=2e-3,
          name="s1_hswish_f32")
    check(x, prm, K=3, stride=1, AF=True, compute_dtype=jnp.bfloat16, tol=5e-2,
          name="s1_hswish_bf16")

    # 2) expand + stride 2 + ReLU (de-interleaved depthwise path, no residual)
    x, prm = make_case(k2, N=2, Cin=8, Cm=24, Cout=16, H=16, W=16, K=3)
    check(x, prm, K=3, stride=2, AF=False, compute_dtype=jnp.float32, tol=2e-3,
          name="s2_relu_f32")

    # 3) no-expand + 5x5 depthwise + residual
    x, prm = make_case(k3, N=2, Cin=16, Cm=16, Cout=16, H=16, W=16, K=5)
    check(x, prm, K=5, stride=1, AF=True, compute_dtype=jnp.float32, tol=2e-3,
          name="k5_noexp_f32")

    print("KERNEL_OK")
</pallas_src>

<mosaic_0001>
module attributes {stable_mosaic.version = 11 : i64} {
  func.func @_fused_block_kernel(%arg0: i32, %arg1: memref<1x8x384xf32, #tpu.memory_space<vmem>>, %arg2: memref<1x1x384xf32, #tpu.memory_space<vmem>>, %arg3: memref<16x8xf32, #tpu.memory_space<vmem>>, %arg4: memref<16x1xf32, #tpu.memory_space<vmem>>, %arg5: memref<16x9xf32, #tpu.memory_space<vmem>>, %arg6: memref<16x1xf32, #tpu.memory_space<vmem>>, %arg7: memref<8x16xf32, #tpu.memory_space<vmem>>, %arg8: memref<8x1xf32, #tpu.memory_space<vmem>>, %arg9: memref<1x8x256xf32, #tpu.memory_space<vmem>>, %arg10: memref<16x384xf32, #tpu.memory_space<vmem>>) attributes {dimension_semantics = [#tpu.dimension_semantics<parallel>], iteration_bounds = array<i64: 2>, scalar_prefetch = 0 : i64, scratch_operands = 1 : i64, tpu.core_type = #tpu.core_type<tc>, window_params = [{transform_indices = @transform_0, window_bounds = array<i64: 1, 8, 384>}, {pipeline_mode = #tpu.pipeline_mode<synchronous>, transform_indices = @transform_1, window_bounds = array<i64: 1, 1, 384>}, {pipeline_mode = #tpu.pipeline_mode<synchronous>, transform_indices = @transform_2, window_bounds = array<i64: 16, 8>}, {pipeline_mode = #tpu.pipeline_mode<synchronous>, transform_indices = @transform_3, window_bounds = array<i64: 16, 1>}, {pipeline_mode = #tpu.pipeline_mode<synchronous>, transform_indices = @transform_4, window_bounds = array<i64: 16, 9>}, {pipeline_mode = #tpu.pipeline_mode<synchronous>, transform_indices = @transform_5, window_bounds = array<i64: 16, 1>}, {pipeline_mode = #tpu.pipeline_mode<synchronous>, transform_indices = @transform_6, window_bounds = array<i64: 8, 16>}, {pipeline_mode = #tpu.pipeline_mode<synchronous>, transform_indices = @transform_7, window_bounds = array<i64: 8, 1>}, {transform_indices = @transform_8, window_bounds = array<i64: 1, 8, 256>}]} {
    %c0 = arith.constant 0 : index
    %c0_0 = arith.constant 0 : index
    %c0_1 = arith.constant 0 : index
    %0 = vector.load %arg1[%c0, %c0_0, %c0_1] : memref<1x8x384xf32, #tpu.memory_space<vmem>>, vector<1x8x384xf32>
    %1 = vector.shape_cast %0 : vector<1x8x384xf32> to vector<8x384xf32>
    %c0_2 = arith.constant 0 : index
    %c0_3 = arith.constant 0 : index
    %2 = vector.load %arg3[%c0_2, %c0_3] : memref<16x8xf32, #tpu.memory_space<vmem>>, vector<16x8xf32>
    %cst = arith.constant dense<0.000000e+00> : vector<16x384xf32>
    %3 = tpu.matmul %2, %1, %cst {dimension_numbers = #tpu.dot_dimension_numbers<[1], [0], [0], [1], [0, 0, 1, 1], [], []>} : vector<16x8xf32>, vector<8x384xf32>, vector<16x384xf32> -> vector<16x384xf32>
    %c0_4 = arith.constant 0 : index
    %c0_5 = arith.constant 0 : index
    %4 = vector.load %arg4[%c0_4, %c0_5] : memref<16x1xf32, #tpu.memory_space<vmem>>, vector<16x1xf32>
    %5 = vector.broadcast %4 : vector<16x1xf32> to vector<16x384xf32>
    %6 = arith.addf %3, %5 : vector<16x384xf32>
    %cst_6 = arith.constant 3.000000e+00 : f32
    %7 = vector.broadcast %cst_6 : f32 to vector<16x384xf32>
    %8 = arith.addf %6, %7 : vector<16x384xf32>
    %cst_7 = arith.constant 0.000000e+00 : f32
    %cst_8 = arith.constant 6.000000e+00 : f32
    %9 = vector.broadcast %cst_7 : f32 to vector<16x384xf32>
    %10 = arith.maximumf %9, %8 : vector<16x384xf32>
    %11 = vector.broadcast %cst_8 : f32 to vector<16x384xf32>
    %12 = arith.minimumf %11, %10 : vector<16x384xf32>
    %13 = arith.mulf %6, %12 : vector<16x384xf32>
    %cst_9 = arith.constant 0.166666672 : f32
    %14 = vector.broadcast %cst_9 : f32 to vector<16x384xf32>
    %15 = arith.mulf %13, %14 : vector<16x384xf32>
    %c0_10 = arith.constant 0 : index
    %c0_11 = arith.constant 0 : index
    %c0_12 = arith.constant 0 : index
    %16 = vector.load %arg2[%c0_10, %c0_11, %c0_12] : memref<1x1x384xf32, #tpu.memory_space<vmem>>, vector<1x1x384xf32>
    %17 = vector.shape_cast %16 : vector<1x1x384xf32> to vector<1x384xf32>
    %18 = vector.broadcast %17 : vector<1x384xf32> to vector<16x384xf32>
    %19 = arith.mulf %15, %18 : vector<16x384xf32>
    %c0_13 = arith.constant 0 : index
    %c0_14 = arith.constant 0 : index
    %20 = vector.load %arg10[%c0_13, %c0_14] : memref<16x384xf32, #tpu.memory_space<vmem>>, vector<16x384xf32>
    tpu.vector_store %arg10[%c0_13, %c0_14], %19 {strides = array<i32>} : memref<16x384xf32, #tpu.memory_space<vmem>>, vector<16x384xf32>,
    %c0_15 = arith.constant 0 : index
    %c0_16 = arith.constant 0 : index
    %21 = vector.load %arg5[%c0_15, %c0_16] : memref<16x9xf32, #tpu.memory_space<vmem>>, vector<16x9xf32>
    %cst_17 = arith.constant 0.000000e+00 : f32
    %22 = vector.broadcast %cst_17 : f32 to vector<16x288xf32>
    %c0_18 = arith.constant 0 : index
    %c0_19 = arith.constant 0 : index
    %23 = vector.load %arg10[%c0_18, %c0_19] : memref<16x384xf32, #tpu.memory_space<vmem>>, vector<16x288xf32>
    %24 = vector.extract_strided_slice %21 {offsets = [0, 0], sizes = [16, 1], strides = [1, 1]} : vector<16x9xf32> to vector<16x1xf32>
    %25 = vector.broadcast %24 : vector<16x1xf32> to vector<16x288xf32>
    %26 = arith.mulf %23, %25 : vector<16x288xf32>
    %27 = arith.addf %22, %26 : vector<16x288xf32>
    %c0_20 = arith.constant 0 : index
    %c18 = arith.constant 18 : index
    %28 = vector.load %arg10[%c0_20, %c18] : memref<16x384xf32, #tpu.memory_space<vmem>>, vector<16x288xf32>
    %29 = vector.extract_strided_slice %21 {offsets = [0, 3], sizes = [16, 1], strides = [1, 1]} : vector<16x9xf32> to vector<16x1xf32>
    %30 = vector.broadcast %29 : vector<16x1xf32> to vector<16x288xf32>
    %31 = arith.mulf %28, %30 : vector<16x288xf32>
    %32 = arith.addf %27, %31 : vector<16x288xf32>
    %c0_21 = arith.constant 0 : index
    %c36 = arith.constant 36 : index
    %33 = vector.load %arg10[%c0_21, %c36] : memref<16x384xf32, #tpu.memory_space<vmem>>, vector<16x288xf32>
    %34 = vector.extract_strided_slice %21 {offsets = [0, 6], sizes = [16, 1], strides = [1, 1]} : vector<16x9xf32> to vector<16x1xf32>
    %35 = vector.broadcast %34 : vector<16x1xf32> to vector<16x288xf32>
    %36 = arith.mulf %33, %35 : vector<16x288xf32>
    %37 = arith.addf %32, %36 : vector<16x288xf32>
    %c0_22 = arith.constant 0 : index
    %c1 = arith.constant 1 : index
    %38 = vector.load %arg10[%c0_22, %c1] : memref<16x384xf32, #tpu.memory_space<vmem>>, vector<16x288xf32>
    %39 = vector.extract_strided_slice %21 {offsets = [0, 1], sizes = [16, 1], strides = [1, 1]} : vector<16x9xf32> to vector<16x1xf32>
    %40 = vector.broadcast %39 : vector<16x1xf32> to vector<16x288xf32>
    %41 = arith.mulf %38, %40 : vector<16x288xf32>
    %42 = arith.addf %37, %41 : vector<16x288xf32>
    %c0_23 = arith.constant 0 : index
    %c19 = arith.constant 19 : index
    %43 = vector.load %arg10[%c0_23, %c19] : memref<16x384xf32, #tpu.memory_space<vmem>>, vector<16x288xf32>
    %44 = vector.extract_strided_slice %21 {offsets = [0, 4], sizes = [16, 1], strides = [1, 1]} : vector<16x9xf32> to vector<16x1xf32>
    %45 = vector.broadcast %44 : vector<16x1xf32> to vector<16x288xf32>
    %46 = arith.mulf %43, %45 : vector<16x288xf32>
    %47 = arith.addf %42, %46 : vector<16x288xf32>
    %c0_24 = arith.constant 0 : index
    %c37 = arith.constant 37 : index
    %48 = vector.load %arg10[%c0_24, %c37] : memref<16x384xf32, #tpu.memory_space<vmem>>, vector<16x288xf32>
    %49 = vector.extract_strided_slice %21 {offsets = [0, 7], sizes = [16, 1], strides = [1, 1]} : vector<16x9xf32> to vector<16x1xf32>
    %50 = vector.broadcast %49 : vector<16x1xf32> to vector<16x288xf32>
    %51 = arith.mulf %48, %50 : vector<16x288xf32>
    %52 = arith.addf %47, %51 : vector<16x288xf32>
    %c0_25 = arith.constant 0 : index
    %c2 = arith.constant 2 : index
    %53 = vector.load %arg10[%c0_25, %c2] : memref<16x384xf32, #tpu.memory_space<vmem>>, vector<16x288xf32>
    %54 = vector.extract_strided_slice %21 {offsets = [0, 2], sizes = [16, 1], strides = [1, 1]} : vector<16x9xf32> to vector<16x1xf32>
    %55 = vector.broadcast %54 : vector<16x1xf32> to vector<16x288xf32>
    %56 = arith.mulf %53, %55 : vector<16x288xf32>
    %57 = arith.addf %52, %56 : vector<16x288xf32>
    %c0_26 = arith.constant 0 : index
    %c20 = arith.constant 20 : index
    %58 = vector.load %arg10[%c0_26, %c20] : memref<16x384xf32, #tpu.memory_space<vmem>>, vector<16x288xf32>
    %59 = vector.extract_strided_slice %21 {offsets = [0, 5], sizes = [16, 1], strides = [1, 1]} : vector<16x9xf32> to vector<16x1xf32>
    %60 = vector.broadcast %59 : vector<16x1xf32> to vector<16x288xf32>
    %61 = arith.mulf %58, %60 : vector<16x288xf32>
    %62 = arith.addf %57, %61 : vector<16x288xf32>
    %c0_27 = arith.constant 0 : index
    %c38 = arith.constant 38 : index
    %63 = vector.load %arg10[%c0_27, %c38] : memref<16x384xf32, #tpu.memory_space<vmem>>, vector<16x288xf32>
    %64 = vector.extract_strided_slice %21 {offsets = [0, 8], sizes = [16, 1], strides = [1, 1]} : vector<16x9xf32> to vector<16x1xf32>
    %65 = vector.broadcast %64 : vector<16x1xf32> to vector<16x288xf32>
    %66 = arith.mulf %63, %65 : vector<16x288xf32>
    %67 = arith.addf %62, %66 : vector<16x288xf32>
    %c0_28 = arith.constant 0 : index
    %c0_29 = arith.constant 0 : index
    %68 = vector.load %arg6[%c0_28, %c0_29] : memref<16x1xf32, #tpu.memory_space<vmem>>, vector<16x1xf32>
    %69 = vector.broadcast %68 : vector<16x1xf32> to vector<16x288xf32>
    %70 = arith.addf %67, %69 : vector<16x288xf32>
    %cst_30 = arith.constant 3.000000e+00 : f32
    %71 = vector.broadcast %cst_30 : f32 to vector<16x288xf32>
    %72 = arith.addf %70, %71 : vector<16x288xf32>
    %cst_31 = arith.constant 0.000000e+00 : f32
    %cst_32 = arith.constant 6.000000e+00 : f32
    %73 = vector.broadcast %cst_31 : f32 to vector<16x288xf32>
    %74 = arith.maximumf %73, %72 : vector<16x288xf32>
    %75 = vector.broadcast %cst_32 : f32 to vector<16x288xf32>
    %76 = arith.minimumf %75, %74 : vector<16x288xf32>
    %77 = arith.mulf %70, %76 : vector<16x288xf32>
    %cst_33 = arith.constant 0.166666672 : f32
    %78 = vector.broadcast %cst_33 : f32 to vector<16x288xf32>
    %79 = arith.mulf %77, %78 : vector<16x288xf32>
    %c0_34 = arith.constant 0 : index
    %c0_35 = arith.constant 0 : index
    %80 = vector.load %arg7[%c0_34, %c0_35] : memref<8x16xf32, #tpu.memory_space<vmem>>, vector<8x16xf32>
    %cst_36 = arith.constant dense<0.000000e+00> : vector<8x288xf32>
    %81 = tpu.matmul %80, %79, %cst_36 {dimension_numbers = #tpu.dot_dimension_numbers<[1], [0], [0], [1], [0, 0, 1, 1], [], []>} : vector<8x16xf32>, vector<16x288xf32>, vector<8x288xf32> -> vector<8x288xf32>
    %c0_37 = arith.constant 0 : index
    %c0_38 = arith.constant 0 : index
    %82 = vector.load %arg8[%c0_37, %c0_38] : memref<8x1xf32, #tpu.memory_space<vmem>>, vector<8x1xf32>
    %83 = vector.broadcast %82 : vector<8x1xf32> to vector<8x288xf32>
    %84 = arith.addf %81, %83 : vector<8x288xf32>
    %85 = vector.extract_strided_slice %1 {offsets = [0, 19], sizes = [8, 288], strides = [1, 1]} : vector<8x384xf32> to vector<8x288xf32>
    %86 = arith.addf %84, %85 : vector<8x288xf32>
    %87 = vector.extract_strided_slice %86 {offsets = [0, 0], sizes = [8, 16], strides = [1, 1]} : vector<8x288xf32> to vector<8x16xf32>
    %c0_39 = arith.constant 0 : index
    %c0_40 = arith.constant 0 : index
    %c0_41 = arith.constant 0 : index
    %88 = vector.load %arg9[%c0_39, %c0_40, %c0_41] : memref<1x8x256xf32, #tpu.memory_space<vmem>>, vector<1x8x16xf32>
    %89 = vector.shape_cast %88 : vector<1x8x16xf32> to vector<8x16xf32>
    %90 = vector.shape_cast %87 : vector<8x16xf32> to vector<1x8x16xf32>
    tpu.vector_store %arg9[%c0_39, %c0_40, %c0_41], %90 {strides = array<i32>} : memref<1x8x256xf32, #tpu.memory_space<vmem>>, vector<1x8x16xf32>,
    %91 = vector.extract_strided_slice %86 {offsets = [0, 18], sizes = [8, 16], strides = [1, 1]} : vector<8x288xf32> to vector<8x16xf32>
    %c0_42 = arith.constant 0 : index
    %c0_43 = arith.constant 0 : index
    %c16 = arith.constant 16 : index
    %92 = vector.load %arg9[%c0_42, %c0_43, %c16] : memref<1x8x256xf32, #tpu.memory_space<vmem>>, vector<1x8x16xf32>
    %93 = vector.shape_cast %92 : vector<1x8x16xf32> to vector<8x16xf32>
    %94 = vector.shape_cast %91 : vector<8x16xf32> to vector<1x8x16xf32>
    tpu.vector_store %arg9[%c0_42, %c0_43, %c16], %94 {strides = array<i32>} : memref<1x8x256xf32, #tpu.memory_space<vmem>>, vector<1x8x16xf32>,
    %95 = vector.extract_strided_slice %86 {offsets = [0, 36], sizes = [8, 16], strides = [1, 1]} : vector<8x288xf32> to vector<8x16xf32>
    %c0_44 = arith.constant 0 : index
    %c0_45 = arith.constant 0 : index
    %c32 = arith.constant 32 : index
    %96 = vector.load %arg9[%c0_44, %c0_45, %c32] : memref<1x8x256xf32, #tpu.memory_space<vmem>>, vector<1x8x16xf32>
    %97 = vector.shape_cast %96 : vector<1x8x16xf32> to vector<8x16xf32>
    %98 = vector.shape_cast %95 : vector<8x16xf32> to vector<1x8x16xf32>
    tpu.vector_store %arg9[%c0_44, %c0_45, %c32], %98 {strides = array<i32>} : memref<1x8x256xf32, #tpu.memory_space<vmem>>, vector<1x8x16xf32>,
    %99 = vector.extract_strided_slice %86 {offsets = [0, 54], sizes = [8, 16], strides = [1, 1]} : vector<8x288xf32> to vector<8x16xf32>
    %c0_46 = arith.constant 0 : index
    %c0_47 = arith.constant 0 : index
    %c48 = arith.constant 48 : index
    %100 = vector.load %arg9[%c0_46, %c0_47, %c48] : memref<1x8x256xf32, #tpu.memory_space<vmem>>, vector<1x8x16xf32>
    %101 = vector.shape_cast %100 : vector<1x8x16xf32> to vector<8x16xf32>
    %102 = vector.shape_cast %99 : vector<8x16xf32> to vector<1x8x16xf32>
    tpu.vector_store %arg9[%c0_46, %c0_47, %c48], %102 {strides = array<i32>} : memref<1x8x256xf32, #tpu.memory_space<vmem>>, vector<1x8x16xf32>,
    %103 = vector.extract_strided_slice %86 {offsets = [0, 72], sizes = [8, 16], strides = [1, 1]} : vector<8x288xf32> to vector<8x16xf32>
    %c0_48 = arith.constant 0 : index
    %c0_49 = arith.constant 0 : index
    %c64 = arith.constant 64 : index
    %104 = vector.load %arg9[%c0_48, %c0_49, %c64] : memref<1x8x256xf32, #tpu.memory_space<vmem>>, vector<1x8x16xf32>
    %105 = vector.shape_cast %104 : vector<1x8x16xf32> to vector<8x16xf32>
    %106 = vector.shape_cast %103 : vector<8x16xf32> to vector<1x8x16xf32>
    tpu.vector_store %arg9[%c0_48, %c0_49, %c64], %106 {strides = array<i32>} : memref<1x8x256xf32, #tpu.memory_space<vmem>>, vector<1x8x16xf32>,
    %107 = vector.extract_strided_slice %86 {offsets = [0, 90], sizes = [8, 16], strides = [1, 1]} : vector<8x288xf32> to vector<8x16xf32>
    %c0_50 = arith.constant 0 : index
    %c0_51 = arith.constant 0 : index
    %c80 = arith.constant 80 : index
    %108 = vector.load %arg9[%c0_50, %c0_51, %c80] : memref<1x8x256xf32, #tpu.memory_space<vmem>>, vector<1x8x16xf32>
    %109 = vector.shape_cast %108 : vector<1x8x16xf32> to vector<8x16xf32>
    %110 = vector.shape_cast %107 : vector<8x16xf32> to vector<1x8x16xf32>
    tpu.vector_store %arg9[%c0_50, %c0_51, %c80], %110 {strides = array<i32>} : memref<1x8x256xf32, #tpu.memory_space<vmem>>, vector<1x8x16xf32>,
    %111 = vector.extract_strided_slice %86 {offsets = [0, 108], sizes = [8, 16], strides = [1, 1]} : vector<8x288xf32> to vector<8x16xf32>
    %c0_52 = arith.constant 0 : index
    %c0_53 = arith.constant 0 : index
    %c96 = arith.constant 96 : index
    %112 = vector.load %arg9[%c0_52, %c0_53, %c96] : memref<1x8x256xf32, #tpu.memory_space<vmem>>, vector<1x8x16xf32>
    %113 = vector.shape_cast %112 : vector<1x8x16xf32> to vector<8x16xf32>
    %114 = vector.shape_cast %111 : vector<8x16xf32> to vector<1x8x16xf32>
    tpu.vector_store %arg9[%c0_52, %c0_53, %c96], %114 {strides = array<i32>} : memref<1x8x256xf32, #tpu.memory_space<vmem>>, vector<1x8x16xf32>,
    %115 = vector.extract_strided_slice %86 {offsets = [0, 126], sizes = [8, 16], strides = [1, 1]} : vector<8x288xf32> to vector<8x16xf32>
    %c0_54 = arith.constant 0 : index
    %c0_55 = arith.constant 0 : index
    %c112 = arith.constant 112 : index
    %116 = vector.load %arg9[%c0_54, %c0_55, %c112] : memref<1x8x256xf32, #tpu.memory_space<vmem>>, vector<1x8x16xf32>
    %117 = vector.shape_cast %116 : vector<1x8x16xf32> to vector<8x16xf32>
    %118 = vector.shape_cast %115 : vector<8x16xf32> to vector<1x8x16xf32>
    tpu.vector_store %arg9[%c0_54, %c0_55, %c112], %118 {strides = array<i32>} : memref<1x8x256xf32, #tpu.memory_space<vmem>>, vector<1x8x16xf32>,
    %119 = vector.extract_strided_slice %86 {offsets = [0, 144], sizes = [8, 16], strides = [1, 1]} : vector<8x288xf32> to vector<8x16xf32>
    %c0_56 = arith.constant 0 : index
    %c0_57 = arith.constant 0 : index
    %c128 = arith.constant 128 : index
    %120 = vector.load %arg9[%c0_56, %c0_57, %c128] : memref<1x8x256xf32, #tpu.memory_space<vmem>>, vector<1x8x16xf32>
    %121 = vector.shape_cast %120 : vector<1x8x16xf32> to vector<8x16xf32>
    %122 = vector.shape_cast %119 : vector<8x16xf32> to vector<1x8x16xf32>
    tpu.vector_store %arg9[%c0_56, %c0_57, %c128], %122 {strides = array<i32>} : memref<1x8x256xf32, #tpu.memory_space<vmem>>, vector<1x8x16xf32>,
    %123 = vector.extract_strided_slice %86 {offsets = [0, 162], sizes = [8, 16], strides = [1, 1]} : vector<8x288xf32> to vector<8x16xf32>
    %c0_58 = arith.constant 0 : index
    %c0_59 = arith.constant 0 : index
    %c144 = arith.constant 144 : index
    %124 = vector.load %arg9[%c0_58, %c0_59, %c144] : memref<1x8x256xf32, #tpu.memory_space<vmem>>, vector<1x8x16xf32>
    %125 = vector.shape_cast %124 : vector<1x8x16xf32> to vector<8x16xf32>
    %126 = vector.shape_cast %123 : vector<8x16xf32> to vector<1x8x16xf32>
    tpu.vector_store %arg9[%c0_58, %c0_59, %c144], %126 {strides = array<i32>} : memref<1x8x256xf32, #tpu.memory_space<vmem>>, vector<1x8x16xf32>,
    %127 = vector.extract_strided_slice %86 {offsets = [0, 180], sizes = [8, 16], strides = [1, 1]} : vector<8x288xf32> to vector<8x16xf32>
    %c0_60 = arith.constant 0 : index
    %c0_61 = arith.constant 0 : index
    %c160 = arith.constant 160 : index
    %128 = vector.load %arg9[%c0_60, %c0_61, %c160] : memref<1x8x256xf32, #tpu.memory_space<vmem>>, vector<1x8x16xf32>
    %129 = vector.shape_cast %128 : vector<1x8x16xf32> to vector<8x16xf32>
    %130 = vector.shape_cast %127 : vector<8x16xf32> to vector<1x8x16xf32>
    tpu.vector_store %arg9[%c0_60, %c0_61, %c160], %130 {strides = array<i32>} : memref<1x8x256xf32, #tpu.memory_space<vmem>>, vector<1x8x16xf32>,
    %131 = vector.extract_strided_slice %86 {offsets = [0, 198], sizes = [8, 16], strides = [1, 1]} : vector<8x288xf32> to vector<8x16xf32>
    %c0_62 = arith.constant 0 : index
    %c0_63 = arith.constant 0 : index
    %c176 = arith.constant 176 : index
    %132 = vector.load %arg9[%c0_62, %c0_63, %c176] : memref<1x8x256xf32, #tpu.memory_space<vmem>>, vector<1x8x16xf32>
    %133 = vector.shape_cast %132 : vector<1x8x16xf32> to vector<8x16xf32>
    %134 = vector.shape_cast %131 : vector<8x16xf32> to vector<1x8x16xf32>
    tpu.vector_store %arg9[%c0_62, %c0_63, %c176], %134 {strides = array<i32>} : memref<1x8x256xf32, #tpu.memory_space<vmem>>, vector<1x8x16xf32>,
    %135 = vector.extract_strided_slice %86 {offsets = [0, 216], sizes = [8, 16], strides = [1, 1]} : vector<8x288xf32> to vector<8x16xf32>
    %c0_64 = arith.constant 0 : index
    %c0_65 = arith.constant 0 : index
    %c192 = arith.constant 192 : index
    %136 = vector.load %arg9[%c0_64, %c0_65, %c192] : memref<1x8x256xf32, #tpu.memory_space<vmem>>, vector<1x8x16xf32>
    %137 = vector.shape_cast %136 : vector<1x8x16xf32> to vector<8x16xf32>
    %138 = vector.shape_cast %135 : vector<8x16xf32> to vector<1x8x16xf32>
    tpu.vector_store %arg9[%c0_64, %c0_65, %c192], %138 {strides = array<i32>} : memref<1x8x256xf32, #tpu.memory_space<vmem>>, vector<1x8x16xf32>,
    %139 = vector.extract_strided_slice %86 {offsets = [0, 234], sizes = [8, 16], strides = [1, 1]} : vector<8x288xf32> to vector<8x16xf32>
    %c0_66 = arith.constant 0 : index
    %c0_67 = arith.constant 0 : index
    %c208 = arith.constant 208 : index
    %140 = vector.load %arg9[%c0_66, %c0_67, %c208] : memref<1x8x256xf32, #tpu.memory_space<vmem>>, vector<1x8x16xf32>
    %141 = vector.shape_cast %140 : vector<1x8x16xf32> to vector<8x16xf32>
    %142 = vector.shape_cast %139 : vector<8x16xf32> to vector<1x8x16xf32>
    tpu.vector_store %arg9[%c0_66, %c0_67, %c208], %142 {strides = array<i32>} : memref<1x8x256xf32, #tpu.memory_space<vmem>>, vector<1x8x16xf32>,
    %143 = vector.extract_strided_slice %86 {offsets = [0, 252], sizes = [8, 16], strides = [1, 1]} : vector<8x288xf32> to vector<8x16xf32>
    %c0_68 = arith.constant 0 : index
    %c0_69 = arith.constant 0 : index
    %c224 = arith.constant 224 : index
    %144 = vector.load %arg9[%c0_68, %c0_69, %c224] : memref<1x8x256xf32, #tpu.memory_space<vmem>>, vector<1x8x16xf32>
    %145 = vector.shape_cast %144 : vector<1x8x16xf32> to vector<8x16xf32>
    %146 = vector.shape_cast %143 : vector<8x16xf32> to vector<1x8x16xf32>
    tpu.vector_store %arg9[%c0_68, %c0_69, %c224], %146 {strides = array<i32>} : memref<1x8x256xf32, #tpu.memory_space<vmem>>, vector<1x8x16xf32>,
    %147 = vector.extract_strided_slice %86 {offsets = [0, 270], sizes = [8, 16], strides = [1, 1]} : vector<8x288xf32> to vector<8x16xf32>
    %c0_70 = arith.constant 0 : index
    %c0_71 = arith.constant 0 : index
    %c240 = arith.constant 240 : index
    %148 = vector.load %arg9[%c0_70, %c0_71, %c240] : memref<1x8x256xf32, #tpu.memory_space<vmem>>, vector<1x8x16xf32>
    %149 = vector.shape_cast %148 : vector<1x8x16xf32> to vector<8x16xf32>
    %150 = vector.shape_cast %147 : vector<8x16xf32> to vector<1x8x16xf32>
    tpu.vector_store %arg9[%c0_70, %c0_71, %c240], %150 {strides = array<i32>} : memref<1x8x256xf32, #tpu.memory_space<vmem>>, vector<1x8x16xf32>,
    return
  }
  func.func @transform_0(%arg0: i32) -> (i32, i32, i32) {
    %c0_i32 = arith.constant 0 : i32
    %c0_i32_0 = arith.constant 0 : i32
    %c0_i32_1 = arith.constant 0 : i32
    return %arg0, %c0_i32, %c0_i32_0 : i32, i32, i32
  }
  func.func @transform_1(%arg0: i32) -> (i32, i32, i32) {
    %c0_i32 = arith.constant 0 : i32
    %c0_i32_0 = arith.constant 0 : i32
    %c0_i32_1 = arith.constant 0 : i32
    %c0_i32_2 = arith.constant 0 : i32
    return %c0_i32, %c0_i32_0, %c0_i32_1 : i32, i32, i32
  }
  func.func @transform_2(%arg0: i32) -> (i32, i32) {
    %c0_i32 = arith.constant 0 : i32
    %c0_i32_0 = arith.constant 0 : i32
    %c0_i32_1 = arith.constant 0 : i32
    return %c0_i32, %c0_i32_0 : i32, i32
  }
  func.func @transform_3(%arg0: i32) -> (i32, i32) {
    %c0_i32 = arith.constant 0 : i32
    %c0_i32_0 = arith.constant 0 : i32
    %c0_i32_1 = arith.constant 0 : i32
    return %c0_i32, %c0_i32_0 : i32, i32
  }
  func.func @transform_4(%arg0: i32) -> (i32, i32) {
    %c0_i32 = arith.constant 0 : i32
    %c0_i32_0 = arith.constant 0 : i32
    %c0_i32_1 = arith.constant 0 : i32
    return %c0_i32, %c0_i32_0 : i32, i32
  }
  func.func @transform_5(%arg0: i32) -> (i32, i32) {
    %c0_i32 = arith.constant 0 : i32
    %c0_i32_0 = arith.constant 0 : i32
    %c0_i32_1 = arith.constant 0 : i32
    return %c0_i32, %c0_i32_0 : i32, i32
  }
  func.func @transform_6(%arg0: i32) -> (i32, i32) {
    %c0_i32 = arith.constant 0 : i32
    %c0_i32_0 = arith.constant 0 : i32
    %c0_i32_1 = arith.constant 0 : i32
    return %c0_i32, %c0_i32_0 : i32, i32
  }
  func.func @transform_7(%arg0: i32) -> (i32, i32) {
    %c0_i32 = arith.constant 0 : i32
    %c0_i32_0 = arith.constant 0 : i32
    %c0_i32_1 = arith.constant 0 : i32
    return %c0_i32, %c0_i32_0 : i32, i32
  }
  func.func @transform_8(%arg0: i32) -> (i32, i32, i32) {
    %c0_i32 = arith.constant 0 : i32
    %c0_i32_0 = arith.constant 0 : i32
    %c0_i32_1 = arith.constant 0 : i32
    return %arg0, %c0_i32, %c0_i32_0 : i32, i32, i32
  }
}

</mosaic_0001>

<bundles_post_ra>
// kernel: tpu_custom_call.1
= control target key start
LH: loop header
LB: loop body
LE: loop exit
PB: predicated region body
PF: predicated region fallthrough
CT: control target
= control target key end

     0   :  { %13 = vsyncpa [#allocation4], 0  ;;  %s1953_s0 = inlined_call_operand.vmem [shape: f32[2,8,384], index: 0, kind: input, shape index: {}]   ;;  %s1954_s1 = inlined_call_operand.hbm [shape: f32[1,1,384], index: 1, kind: input, shape index: {}]   ;;  %s1955_s2 = inlined_call_operand.vmem [shape: f32[16,8], index: 2, kind: input, shape index: {}]   ;;  %s1956_s3 = inlined_call_operand.vmem [shape: f32[16,1], index: 3, kind: input, shape index: {}]   ;;  %s1957_s4 = inlined_call_operand.vmem [shape: f32[16,9], index: 4, kind: input, shape index: {}]   ;;  %s1958_s5 = inlined_call_operand.vmem [shape: f32[16,1], index: 5, kind: input, shape index: {}]   ;;  %s1959_s6 = inlined_call_operand.vmem [shape: f32[8,16], index: 6, kind: input, shape index: {}]   ;;  %s1960_s7 = inlined_call_operand.vmem [shape: f32[8,1], index: 7, kind: input, shape index: {}]   ;;  %s1961_s8 = inlined_call_operand.hbm [shape: f32[2,8,256], index: 8, kind: output, shape index: {}]  }
   0x1   :  { %14 = vsyncpa [#allocation5], 0 }
   0x2   :  { %16 = vsyncpa [#allocation5 + $0x1], 0  ;;  %s1482_s27 = smov 0   ;;  %s1484_s28 = smov 0  }
   0x3   :  { %s1486_s29 = smov 0   ;;  %s1488_s30 = smov 0  }
   0x4 LB: > { %s1503_s9 = sadd.s32 4294967295, %s1405_s30   ;;  %s1187_s10 = sadd.s32 4294967294, %s1405_s30   ;;  %s1405_s30 = sphi %s1488_s30, %s1967_s30   ;;  %s1401_s29 = sphi %s1486_s29, %s1966_s29   ;;  %s1397_s28 = sphi %s1484_s28, %s1965_s28   ;;  %s1393_s27 = sphi %s1482_s27, %s1964_s27  }
   0x5   : > { %s1507_s11 = sadd.s32 1, %s1405_s30   ;;  %s202_s12 = sadd.s32 1, %s1401_s29 }
   0x6   : > { %s199_s13 = ssub.s32 %s1405_s30, %s1507_s11  ;;  %p212_p0 = scmp.ne.s32.totalorder %s1401_s29, %s1397_s28 }
   0x7   : > { %p200_p1 = scmp.eq.s32.totalorder %s199_s13, 0  ;;  %p213_p2 = scmp.eq.s32.totalorder %s1503_s9, 1 }
   0x8   : > { %p218_p3 = scmp.ne.s32.totalorder %s1397_s28, %s1393_s27  ;;  %p219_p4 = scmp.eq.s32.totalorder %s1187_s10, 1 }
   0x9   : > { %s1518_s14 = scalar_select %p200_p1, %s1401_s29, %s202_s12  }
   0xa   : > { %p1520_p5 = por %p213_p2, %p212_p0  ;;  %p1524_p6 = por %p219_p4, %p218_p3 }
   0xb   : > { %p1188_p7 = scmp.ge.s32.totalorder %s1405_s30, 1  ;;  %p226_p8 = scmp.lt.s32.totalorder %s1405_s30, 3 }
   0xc   : > { %p1225_p9 = scmp.eq.s32.totalorder %s1503_s9, 0  ;;  %s238_s19 = sshll.u32 %s1954_s1, 4  ;;  %s239_s19 = int_to_ptr.hbm [resolvable:$true] %s238_s19 }
   0xd   : > { %p227_p10 = pnand %p1188_p7, %p226_p8  ;;  %s1407_s20 = smov [#allocation3]  }
   0xe   : > { %s240_s21 = sshll.u32 %s1407_s20, 4  ;;  %s241_s21 = int_to_ptr.vmem [resolvable:$true] %s240_s21 }
   0xf   : > { %p1217_p11 = pneg %p227_p10  ;;  %279 = sbr.rel (%p227_p10) target bundleno = 715 (0x2cb), region = 52 }
  0x11   : > { %p1218_p12 = pnand %p1225_p9, %p1217_p11 }
  0x13   : > { %1220 = dma.hbm_to_vmem [thread:$0]  (!%p1218_p12), %s239_s19, 48, %s241_s21, [#allocation4]  }
  0x14   : > { %1384 = dma.done.wait (%p1225_p9), [#allocation4], 48  }
  0x15   : > { %1386 = vsyncadd (%p1225_p9), [#allocation4], 4294967248  ;;  %p314_p13 = scmp.lt.s32.totalorder %s1503_s9, 1  ;;  %v1408_v0 = vmov 3   ;;  %v1409_v1 = vmov 0   ;;  %v462_v2 = vld [vmem:[%s1957_s4] sm:$0xff] }
  0x16   : > { %1292 = vset.pattern.permute.xlu2 %v1408_v0  ;;  %1291 = vset.pattern.permute.xlu1 %v1409_v1  ;;  %v324_v3 = vld [vmem:[%s1956_s3] sm:$0xff]  ;;  %vm336_vm0 = vcmask 64512   ;;  %v463_v8 = vld [vmem:[%s1957_s4 + $0x8] sm:$0xff]  ;;  %v1410_v11 = vmov 6   ;;  %v1411_v12 = vmov 1   ;;  %v1412_v13 = vmov 4  }
  0x17   : > { %1290 = vset.pattern.permute.xlu0 %v1409_v1  ;;  %s315_s22 = scalar_select %p314_p13, %s1503_s9, 1  ;;  %493 = vperm.xlu2 %1292, %v462_v2   ;;  %v322_v7 = vld [vmem:[%s1955_s2] sm:$0xff]  ;;  %v325_v9 = vld [vmem:[%s1956_s3 + $0x8] sm:$0xff]  ;;  %v1413_v14 = vmov 7   ;;  %v1414_v15 = vmov 5   ;;  %v1415_v16 = vmov 2  }
  0x18   : > { %472 = vperm.xlu1 %1291, %v462_v2   ;;  %328 = vperm.xlu0 %1290, %v324_v3   ;;  %v323_v10 = vld [vmem:[%s1955_s2 + $0x8] sm:$0xff]  ;;  %v1416_v17 = vmov 8   ;;  %v1588_v33 = vld [vmem:[#allocation3] sm:$0x7]  ;;  %s1418_s10 = smov 110   ;;  %s1419_s12 = smov 109  }
  0x19   : > { %s1210_s23 = smul.u32 24, %s315_s22  ;;  %v444_v39 = vperm.slane %v1588_v33, 0  ;;  %v445_v40 = vperm.slane %v1588_v33, 1  ;;  %v446_v61 = vperm.slane %v1588_v33, 2  ;;  %s1420_s13 = smov 127   ;;  %vm524_vm1 = vcmask 900096  }
  0x1a   : > { %s1421_s17 = smov 91   ;;  %s1422_s18 = smov 126   ;;  %vm573_vm2 = vcmask 752640   ;;  %vm622_vm3 = vcmask 1039360   ;;  %vm671_vm4 = vcmask 891904   ;;  %vm720_vm5 = vcmask 744448  }
  0x1b   : > { %s318_s26 = scalar_lea.vmem %s1953_s0, %s1210_s23  ;;  %s1423_s19 = smov 108   ;;  %vm769_vm6 = vcmask 1031168   ;;  %vm818_vm7 = vcmask 883712   ;;  %vm867_vm8 = vcmask 736256   ;;  %vm939_vm9 = vcmask 130048  }
  0x1c   : > { %v1547_v4 = vld [vmem:[%s318_s26] sm:$0xff]  ;;  %v1549_v5 = vld [vmem:[%s318_s26 + $0x8] sm:$0xff]  ;;  %v1551_v6 = vld [vmem:[%s318_s26 + $0x10] sm:$0xff]  ;;  %s1417_s26 = smov 92   ;;  %s1424_s20 = smov 90   ;;  %vm1025_vm10 = vcmask 261248  }
  0x1d   : > { %358 = vmatpush.msra.mxu0 %v1547_v4  ;;  %381 = vmatpush.msra.mxu1 %v1549_v5  ;;  %s1425_s21 = smov 122   ;;  %s1426_s22 = smov 124   ;;  %vm1030_vm11 = vcmask 392448   ;;  %vm1035_vm12 = vcmask 523648   ;;  %vm1040_vm13 = vcmask 654848   ;;  %vm1045_vm14 = vcmask 786048  }
  0x1e   : > { %404 = vmatpush.msra.mxu2 %v1551_v6  ;;  %1195 = vmatmul.msk.f32.vlgmr.msra.gmra.mxu0 %vm336_vm0, %v322_v7  ;;  %s1427_s24 = smov 100   ;;  %s1428_s25 = smov 120   ;;  %vm1050_vm15 = vcmask 917248  }
  0x1f   : > { %1197 = vmatmul.msk.f32.vlgmr.msra.gmra.mxu1 %vm336_vm0, %v322_v7  ;;  %1199 = vmatmul.msk.f32.vlgmr.msra.gmra.mxu2 %vm336_vm0, %v322_v7 }
  0x20   : > { %497 = vperm.xlu2 %1292, %v463_v8   ;;  %477 = vperm.xlu1 %1291, %v463_v8  }
  0x21   : > { %333 = vperm.xlu0 %1290, %v325_v9  }
  0x26   : > { %1196 = vmatmul.msk.f32.gmra.mxu0 %vm336_vm0, %v323_v10 }
  0x27   : > { %1198 = vmatmul.msk.f32.gmra.mxu1 %vm336_vm0, %v323_v10  ;;  %1200 = vmatmul.msk.f32.gmra.mxu2 %vm336_vm0, %v323_v10  ;;  %vm1091_vm0 = vcmask 818176  }
  0x28   : > { %1293 = vset.pattern.permute.xlu2 %v1410_v11  ;;  %1295 = vset.pattern.permute.xlu1 %v1411_v12 }
  0x29   : > { %1294 = vset.pattern.permute.xlu0 %v1410_v11  ;;  %546 = vperm.xlu2 %1293, %v463_v8  }
  0x2a   : > { %595 = vperm.xlu1 %1295, %v463_v8   ;;  %542 = vperm.xlu0 %1294, %v462_v2  }
  0x31   : > { %1296 = vset.pattern.permute.xlu2 %v1411_v12 }
  0x32   : > { %1297 = vset.pattern.permute.xlu1 %v1412_v13  ;;  %1299 = vset.pattern.permute.xlu0 %v1413_v14 }
  0x33   : > { %591 = vperm.xlu2 %1296, %v462_v2   ;;  %644 = vperm.xlu1 %1297, %v463_v8  }
  0x34   : > { %693 = vperm.xlu0 %1299, %v463_v8  }
  0x3b   : > { %1298 = vset.pattern.permute.xlu2 %v1412_v13  ;;  %1300 = vset.pattern.permute.xlu1 %v1413_v14 }
  0x3c   : > { %1304 = vset.pattern.permute.xlu0 %v1414_v15  ;;  %640 = vperm.xlu2 %1298, %v462_v2  }
  0x3d   : > { %689 = vperm.xlu1 %1300, %v462_v2   ;;  %787 = vperm.xlu0 %1304, %v462_v2  }
  0x44   : > { %1301 = vset.pattern.permute.xlu2 %v1415_v16 }
  0x45   : > { %1302 = vset.pattern.permute.xlu1 %v1415_v16  ;;  %742 = vperm.xlu2 %1301, %v463_v8  }
  0x46   : > { %738 = vperm.xlu1 %1302, %v462_v2   ;;  %1308 = vset.pattern.permute.xlu0 %v1409_v1 }
  0x4d   : > { %1303 = vset.pattern.permute.xlu2 %v1414_v15 }
  0x4e   : > { %1305 = vset.pattern.permute.xlu1 %v1416_v17  ;;  %791 = vperm.xlu2 %1303, %v463_v8  }
  0x4f   : > { %840 = vperm.xlu1 %1305, %v463_v8  }
  0x56   : > { %1306 = vset.pattern.permute.xlu2 %v1416_v17 }
  0x57   : > { %836 = vperm.xlu2 %1306, %v462_v2   ;;  %1307 = vset.pattern.permute.xlu1 %v1409_v1 }
  0x71   : > { %v1576_v18 = vpop.permute.xlu2 %493 }
  0x7a   : > { %v1578_v19 = vpop.permute.xlu2 %497 }
  0x83   : > { %v1582_v21 = vpop.permute.xlu2 %546 }
  0x8a   : > { %v1580_v20 = vpop.permute.xlu1 %472  ;;  %v329_v22 = vpop.permute.xlu0 %328 }
  0x8d   : > { %v1586_v24 = vpop.permute.xlu2 %591 }
  0x92   : > { %v1584_v23 = vpop.permute.xlu1 %477 }
  0x93   : > { %v334_v31 = vpop.permute.xlu0 %333 }
  0x96   : > { %v1594_v46 = vpop.permute.xlu2 %640 }
  0x9b   : > { %v360_v25 = vpop.f32.mrf.mxu0 }
  0x9c   : > { %v383_v26 = vpop.f32.mrf.mxu1  ;;  %v361_v27 = vadd.f32 %v360_v25, %v329_v22  ;;  %v1590_v35 = vpop.permute.xlu1 %595 }
  0x9d   : > { %v384_v28 = vadd.f32 %v383_v26, %v329_v22  ;;  %v1600_v60 = vpop.permute.xlu0 %542 }
  0x9e   : > { %v412_v29 = vadd.f32 3.0, %v361_v27 }
  0x9f   : > { %v413_v30 = vadd.f32 3.0, %v384_v28  ;;  %v1612_v14 = vpop.permute.xlu2 %742 }
  0xa0   : > { %v418_v32 = vmax.f32 %v412_v29, 0.0 }
  0xa1   : > { %v419_v34 = vmax.f32 %v413_v30, 0.0 }
  0xa2   : > { %v424_v36 = vmin.f32 %v418_v32, 6.0  ;;  %v406_v38 = vpop.f32.mrf.mxu2 }
  0xa3   : > { %v425_v37 = vmin.f32 %v419_v34, 6.0  ;;  %v407_v41 = vadd.f32 %v406_v38, %v329_v22  ;;  %v363_v42 = vpop.f32.mrf.mxu0 }
  0xa4   : > { %v386_v43 = vpop.f32.mrf.mxu1  ;;  %v430_v44 = vmul.f32 %v424_v36, %v361_v27  ;;  %v364_v47 = vadd.f32 %v363_v42, %v334_v31 }
  0xa5   : > { %v431_v45 = vmul.f32 %v425_v37, %v384_v28  ;;  %v387_v48 = vadd.f32 %v386_v43, %v334_v31  ;;  %v414_v49 = vadd.f32 3.0, %v407_v41  ;;  %v1605_v7 = vpop.permute.xlu1 %644 }
  0xa6   : > { %v436_v50 = vmul.f32 0.16666667, %v430_v44  ;;  %v415_v52 = vadd.f32 3.0, %v364_v47 }
  0xa7   : > { %v437_v51 = vmul.f32 0.16666667, %v431_v45  ;;  %v416_v53 = vadd.f32 3.0, %v387_v48  ;;  %v420_v54 = vmax.f32 %v414_v49, 0.0 }
  0xa8   : > { %v1596_v55 = vmul.f32 %v444_v39, %v436_v50  ;;  %v421_v57 = vmax.f32 %v415_v52, 0.0 }
  0xa9   : > { %v1598_v56 = vmul.f32 %v445_v40, %v437_v51  ;;  %v422_v58 = vmax.f32 %v416_v53, 0.0  ;;  %v426_v59 = vmin.f32 %v420_v54, 6.0 }
  0xaa   : > { %v549_v62 = vmul.f32 %v1600_v60, %v1596_v55  ;;  %v409_v63 = vpop.f32.mrf.mxu2  ;;  %v427_v1 = vmin.f32 %v421_v57, 6.0  ;;  %v500_v9 = vmul.f32 %v1576_v18, %v1596_v55  ;;  %v1618_v15 = vmul.f32 %v1580_v20, %v1596_v55 }
  0xab   : > { %v432_v0 = vmul.f32 %v426_v59, %v407_v41  ;;  %v428_v2 = vmin.f32 %v422_v58, 6.0  ;;  %v410_v3 = vadd.f32 %v409_v63, %v334_v31  ;;  %v501_v8 = vmul.f32 %v1576_v18, %v1598_v56  ;;  %v1649_v41 = vpop.permute.xlu2 %791 }
  0xac   : > { %561 = vrot.lane.b32.xlu2 %v549_v62, %s1417_s26  ;;  %v433_v13 = vmul.f32 %v427_v1, %v364_v47  ;;  %512 = vrot.lane.b32.xlu0 %v500_v9, %s1418_s10  ;;  %v1622_v16 = vmul.f32 %v1580_v20, %v1598_v56  ;;  %v647_v28 = vmul.f32 %v1594_v46, %v1596_v55 }
  0xad   : > { %v438_v10 = vmul.f32 0.16666667, %v432_v0  ;;  %v434_v11 = vmul.f32 %v428_v2, %v387_v48  ;;  %v417_v12 = vadd.f32 3.0, %v410_v3  ;;  %514 = vrot.lane.b32.xlu1 %v501_v8, %s1418_s10  ;;  %v599_v33 = vmul.f32 %v1586_v24, %v1598_v56 }
  0xae   : > { %v439_v29 = vmul.f32 0.16666667, %v433_v13  ;;  %v550_v34 = vmul.f32 %v1600_v60, %v1598_v56  ;;  %v598_v57 = vmul.f32 %v1586_v24, %v1596_v55 }
  0xaf   : > { %v1624_v17 = vmul.f32 %v446_v61, %v438_v10  ;;  %v440_v22 = vmul.f32 0.16666667, %v434_v11  ;;  %v423_v25 = vmax.f32 %v417_v12, 0.0  ;;  %v1643_v37 = vpop.permute.xlu1 %689 }
  0xb0   : > { %v453_v38 = vmul.f32 %v444_v39, %v439_v29  ;;  %v696_v44 = vmul.f32 %v1643_v37, %v1596_v55 }
  0xb1   : > { %v1626_v26 = vmul.f32 %v445_v40, %v440_v22  ;;  %v429_v27 = vmin.f32 %v423_v25, 6.0  ;;  %v1632_v30 = vmul.f32 %v1580_v20, %v1624_v17  ;;  %v694_v40 = vpop.permute.xlu0 %693  ;;  %v600_v25 = vmul.f32 %v1586_v24, %v1624_v17 }
  0xb2   : > { %v552_v48 = vmul.f32 %v1582_v21, %v453_v38  ;;  %v1678_v51 = vmul.f32 %v1584_v23, %v453_v38  ;;  %v503_v54 = vmul.f32 %v1578_v19, %v453_v38  ;;  %v601_v0 = vmul.f32 %v1590_v35, %v453_v38 }
  0xb3   : > { %v435_v31 = vmul.f32 %v429_v27, %v410_v3  ;;  %v1636_v32 = vmul.f32 %v1605_v7, %v1626_v26  ;;  %v1682_v52 = vmul.f32 %v1584_v23, %v1626_v26  ;;  %v504_v1 = vmul.f32 %v1578_v19, %v1626_v26  ;;  %v837_v27 = vpop.permute.xlu2 %836 }
  0xb4   : > { %659 = vrot.lane.b32.xlu2 %v647_v28, %s1419_s12  ;;  %563 = vrot.lane.b32.xlu0 %v550_v34, %s1417_s26  ;;  %v699_v2 = vmul.f32 %v694_v40, %v453_v38  ;;  %v602_v8 = vmul.f32 %v1590_v35, %v1626_v26  ;;  %v748_v9 = vmul.f32 %v1612_v14, %v453_v38 }
  0xb5   : > { %v441_v36 = vmul.f32 0.16666667, %v435_v31  ;;  %612 = vrot.lane.b32.xlu1 %v599_v33, %s1420_s13  ;;  %v650_v10 = vmul.f32 %v1605_v7, %v453_v38  ;;  %v797_v11 = vmul.f32 %v1649_v41, %v453_v38  ;;  %v700_v13 = vmul.f32 %v694_v40, %v1626_v26  ;;  %v885_v33 = vld [vmem:[%s1958_s5 + $0x8] sm:$0xff] }
  0xb6   : > { %v843_v28 = vmul.f32 %v837_v27, %v1596_v55  ;;  %v649_v29 = vmul.f32 %v1594_v46, %v1624_v17  ;;  %v698_v31 = vmul.f32 %v1643_v37, %v1624_v17 }
  0xb7   : > { %v1646_v20 = vmul.f32 %v446_v61, %v441_v36  ;;  %v648_v61 = vmul.f32 %v1594_v46, %v1598_v56 }
  0xb8   : > { %v1693_v58 = vpop.permute.xlu1 %738 }
  0xb9   : > { %v1653_v42 = vmul.f32 %v1605_v7, %v1646_v20  ;;  %v1656_v43 = vmul.f32 %v694_v40, %v1646_v20  ;;  %v1660_v39 = vmul.f32 %v1649_v41, %v1646_v20  ;;  %v505_v45 = vmul.f32 %v1578_v19, %v1646_v20  ;;  %v1704_v62 = vpop.permute.xlu0 %787 }
  0xba   : > { %v554_v47 = vmul.f32 %v1582_v21, %v1646_v20  ;;  %v1671_v49 = vmul.f32 %v1590_v35, %v1646_v20  ;;  %v1675_v50 = vmul.f32 %v1612_v14, %v1646_v20  ;;  %v1686_v53 = vmul.f32 %v1584_v23, %v1646_v20 }
  0xbb   : > { %v745_v59 = vmul.f32 %v1693_v58, %v1596_v55  ;;  %v553_v23 = vmul.f32 %v1582_v21, %v1626_v26  ;;  %v794_v63 = vmul.f32 %v1704_v62, %v1596_v55  ;;  %v697_v21 = vmul.f32 %v1643_v37, %v1598_v56 }
  0xbc   : > { %708 = vrot.lane.b32.xlu2 %v696_v44, %s1421_s17  ;;  %610 = vrot.lane.b32.xlu0 %v598_v57, %s1420_s13  ;;  %v746_v3 = vmul.f32 %v1693_v58, %v1598_v56  ;;  %v795_v19 = vmul.f32 %v1704_v62, %v1598_v56  ;;  %v502_v35 = vmul.f32 %v1576_v18, %v1624_v17 }
  0xbd   : > { %518 = vrot.lane.b32.xlu1 %v503_v54, %s1418_s10  ;;  %v551_v7 = vmul.f32 %v1600_v60, %v1624_v17  ;;  %v749_v18 = vmul.f32 %v1612_v14, %v1626_v26  ;;  %v798_v60 = vmul.f32 %v1649_v41, %v1626_v26  ;;  %v747_v46 = vmul.f32 %v1693_v58, %v1624_v17  ;;  %v884_v41 = vld [vmem:[%s1958_s5] sm:$0xff] }
  0xc1   : > { %v841_v12 = vpop.permute.xlu1 %840 }
  0xc2   : > { %v846_v22 = vmul.f32 %v841_v12, %v453_v38  ;;  %v847_v14 = vmul.f32 %v841_v12, %v1626_v26  ;;  %v848_v38 = vmul.f32 %v841_v12, %v1646_v20  ;;  %v845_v20 = vmul.f32 %v837_v27, %v1624_v17 }
  0xc4   : > { %757 = vrot.lane.b32.xlu2 %v745_v59, %s1422_s18  ;;  %661 = vrot.lane.b32.xlu0 %v648_v61, %s1419_s12 }
  0xc5   : > { %569 = vrot.lane.b32.xlu1 %v553_v23, %s1417_s26 }
  0xcc   : > { %806 = vrot.lane.b32.xlu2 %v794_v63, %s1423_s19  ;;  %710 = vrot.lane.b32.xlu0 %v697_v21, %s1421_s17 }
  0xcd   : > { %616 = vrot.lane.b32.xlu1 %v601_v0, %s1420_s13 }
  0xd4   : > { %520 = vrot.lane.b32.xlu2 %v504_v1, %s1418_s10  ;;  %759 = vrot.lane.b32.xlu0 %v746_v3, %s1422_s18 }
  0xd5   : > { %714 = vrot.lane.b32.xlu1 %v699_v2, %s1421_s17 }
  0xdc   : > { %618 = vrot.lane.b32.xlu2 %v602_v8, %s1420_s13  ;;  %808 = vrot.lane.b32.xlu0 %v795_v19, %s1423_s19 }
  0xdd   : > { %763 = vrot.lane.b32.xlu1 %v748_v9, %s1422_s18 }
  0xe4   : > { %665 = vrot.lane.b32.xlu2 %v650_v10, %s1419_s12  ;;  %516 = vrot.lane.b32.xlu0 %v502_v35, %s1418_s10 }
  0xe5   : > { %812 = vrot.lane.b32.xlu1 %v797_v11, %s1423_s19 }
  0xec   : > { %716 = vrot.lane.b32.xlu2 %v700_v13, %s1421_s17  ;;  %565 = vrot.lane.b32.xlu0 %v551_v7, %s1417_s26 }
  0xed   : > { %861 = vrot.lane.b32.xlu1 %v846_v22, %s1424_s20 }
  0xf4   : > { %765 = vrot.lane.b32.xlu2 %v749_v18, %s1422_s18  ;;  %614 = vrot.lane.b32.xlu0 %v600_v25, %s1420_s13 }
  0xf5   : > { %522 = vrot.lane.b32.xlu1 %v505_v45, %s1418_s10 }
  0xfc   : > { %814 = vrot.lane.b32.xlu2 %v798_v60, %s1423_s19  ;;  %567 = vrot.lane.b32.xlu0 %v552_v48, %s1417_s26 }
  0xfd   : > { %571 = vrot.lane.b32.xlu1 %v554_v47, %s1417_s26  ;;  %s1429_s26 = smov 112  }
 0x104   : > { %863 = vrot.lane.b32.xlu2 %v847_v14, %s1424_s20  ;;  %667 = vrot.lane.b32.xlu0 %v1636_v32, %s1419_s12  ;;  %v844_v32 = vmul.f32 %v837_v27, %v1598_v56 }
 0x105   : > { %620 = vrot.lane.b32.xlu1 %v1671_v49, %s1420_s13  ;;  %s1431_s13 = smov 104  }
 0x106   : > { %v562_v24 = vpop.permute.xlu2 %561 }
 0x10c   : > { %855 = vrot.lane.b32.xlu2 %v843_v28, %s1424_s20  ;;  %663 = vrot.lane.b32.xlu0 %v649_v29, %s1419_s12 }
 0x10d   : > { %669 = vrot.lane.b32.xlu1 %v1653_v42, %s1419_s12 }
 0x10e   : > { %v660_v26 = vpop.permute.xlu2 %659 }
 0x114   : > { %712 = vrot.lane.b32.xlu2 %v698_v31, %s1421_s17  ;;  %857 = vrot.lane.b32.xlu0 %v844_v32, %s1424_s20 }
 0x115   : > { %718 = vrot.lane.b32.xlu1 %v1656_v43, %s1421_s17  ;;  %s311_s17 = sand.u32 1, %s1397_s28  }
 0x116   : > { %v709_v55 = vpop.permute.xlu2 %708 }
 0x11c   : > { %761 = vrot.lane.b32.xlu2 %v747_v46, %s1422_s18  ;;  %767 = vrot.lane.b32.xlu0 %v1675_v50, %s1422_s18 }
 0x11d   : > { %893 = vperm.xlu1 %1307, %v885_v33  }
 0x11e   : > { %v758_v34 = vpop.permute.xlu2 %757  ;;  %v513_v36 = vpop.permute.xlu0 %512 }
 0x11f   : > { %v515_v56 = vpop.permute.xlu1 %514 }
 0x120   : > { %v525_v37 = vsel %vm524_vm1, %v513_v36, %v515_v56 }
 0x121   : > { %v535_v40 = vadd.f32 %v525_v37, %v1618_v15  ;;  %v796_v15 = vmul.f32 %v1704_v62, %v1624_v17 }
 0x124   : > { %865 = vrot.lane.b32.xlu2 %v848_v38, %s1424_s20  ;;  %816 = vrot.lane.b32.xlu0 %v1660_v39, %s1423_s19 }
 0x125   : > { %888 = vperm.xlu1 %1307, %v884_v41  }
 0x126   : > { %v807_v42 = vpop.permute.xlu2 %806  ;;  %v564_v44 = vpop.permute.xlu0 %563 }
 0x127   : > { %v613_v43 = vpop.permute.xlu1 %612  ;;  %v574_v45 = vsel %vm573_vm2, %v562_v24, %v564_v44 }
 0x128   : > { %v584_v47 = vadd.f32 %v574_v45, %v535_v40 }
 0x12c   : > { %1008 = vrot.lane.b32.xlu2 %v1549_v5, %s1419_s12  ;;  %859 = vrot.lane.b32.xlu0 %v845_v20, %s1424_s20  ;;  %v933_v5 = vld [vmem:[%s1960_s7] sm:$0xff]  ;;  %s1193_s20 = sshll.u32 %s311_s17, 4 }
 0x12d   : > { %810 = vrot.lane.b32.xlu1 %v796_v15, %s1423_s19  ;;  %s1883_s23 = scalar_lea.vmem [#allocation6], %s1193_s20  ;;  %s1432_s20 = smov 118  }
 0x12e   : > { %v521_v48 = vpop.permute.xlu2 %520  ;;  %v611_v50 = vpop.permute.xlu0 %610 }
 0x12f   : > { %v519_v39 = vpop.permute.xlu1 %518  ;;  %v623_v57 = vsel %vm622_vm3, %v611_v50, %v613_v43 }
 0x130   : > { %v527_v49 = vsel %vm524_vm1, %v519_v39, %v521_v48  ;;  %v633_v58 = vadd.f32 %v623_v57, %v584_v47 }
 0x131   : > { %v538_v54 = vadd.f32 %v527_v49, %v1678_v51 }
 0x134   : > { %1010 = vrot.lane.b32.xlu0 %v1551_v6, %s1419_s12 }
 0x135   : > { %936 = vperm.xlu1 %1307, %v933_v5  }
 0x136   : > { %v1806_v17 = vpop.permute.xlu2 %618  ;;  %v662_v23 = vpop.permute.xlu0 %661 }
 0x137   : > { %v570_v59 = vpop.permute.xlu1 %569  ;;  %v672_v61 = vsel %vm671_vm4, %v660_v26, %v662_v23 }
 0x138   : > { %v682_v62 = vadd.f32 %v672_v61, %v633_v58 }
 0x13d   : > { %1006 = vrot.lane.b32.xlu1 %v1547_v4, %s1419_s12  ;;  %s1430_s12 = smov 116  }
 0x13e   : > { %v666_v51 = vpop.permute.xlu2 %665  ;;  %v711_v0 = vpop.permute.xlu0 %710 }
 0x13f   : > { %v617_v63 = vpop.permute.xlu1 %616  ;;  %v721_v21 = vsel %vm720_vm5, %v709_v55, %v711_v0 }
 0x140   : > { %v731_v1 = vadd.f32 %v721_v21, %v682_v62  ;;  %v625_v38 = vsel %vm622_vm3, %v617_v63, %v1806_v17 }
 0x146   : > { %v1814_v2 = vpop.permute.xlu2 %716  ;;  %v760_v6 = vpop.permute.xlu0 %759 }
 0x147   : > { %v715_v3 = vpop.permute.xlu1 %714  ;;  %v770_v8 = vsel %vm769_vm6, %v758_v34, %v760_v6 }
 0x148   : > { %v780_v9 = vadd.f32 %v770_v8, %v731_v1  ;;  %v723_v15 = vsel %vm720_vm5, %v715_v3, %v1814_v2 }
 0x14e   : > { %v1817_v10 = vpop.permute.xlu2 %765  ;;  %v1819_v11 = vpop.permute.xlu0 %808 }
 0x14f   : > { %v764_v19 = vpop.permute.xlu1 %763  ;;  %v819_v4 = vsel %vm818_vm7, %v807_v42, %v1819_v11 }
 0x150   : > { %v1823_v35 = vadd.f32 %v819_v4, %v780_v9  ;;  %v772_v57 = vsel %vm769_vm6, %v764_v19, %v1817_v10 }
 0x156   : > { %v517_v13 = vpop.permute.xlu0 %516  ;;  %v1826_v7 = vpop.permute.xlu2 %814 }
 0x157   : > { %v813_v12 = vpop.permute.xlu1 %812  ;;  %v526_v22 = vsel %vm524_vm1, %v515_v56, %v517_v13  ;;  %v537_v8 = vadd.f32 %v517_v13, %v1632_v30 }
 0x158   : > { %v536_v18 = vadd.f32 %v526_v22, %v1622_v16 }
 0x15e   : > { %v566_v60 = vpop.permute.xlu0 %565  ;;  %v1830_v24 = vpop.permute.xlu2 %863 }
 0x15f   : > { %v862_v25 = vpop.permute.xlu1 %861  ;;  %v575_v27 = vsel %vm573_vm2, %v564_v44, %v566_v60  ;;  %v586_v22 = vadd.f32 %v566_v60, %v537_v8 }
 0x160   : > { %v585_v14 = vadd.f32 %v575_v27, %v536_v18  ;;  %v870_v63 = vsel %vm867_vm8, %v862_v25, %v1830_v24 }
 0x166   : > { %v615_v26 = vpop.permute.xlu0 %614  ;;  %v856_v46 = vpop.permute.xlu2 %855 }
 0x167   : > { %v523_v28 = vpop.permute.xlu1 %522  ;;  %v624_v32 = vsel %vm622_vm3, %v613_v43, %v615_v26 }
 0x168   : > { %v528_v29 = vsel %vm524_vm1, %v521_v48, %v523_v28  ;;  %v634_v55 = vadd.f32 %v624_v32, %v585_v14  ;;  %vm1057_vm1 = vcmask 932864  }
 0x169   : > { %v539_v31 = vadd.f32 %v528_v29, %v1682_v52 }
 0x16e   : > { %v568_v34 = vpop.permute.xlu0 %567  ;;  %v713_v42 = vpop.permute.xlu2 %712 }
 0x16f   : > { %v572_v33 = vpop.permute.xlu1 %571  ;;  %v576_v36 = vsel %vm573_vm2, %v568_v34, %v570_v59  ;;  %v722_v50 = vsel %vm720_vm5, %v711_v0, %v713_v42  ;;  %v540_v0 = vadd.f32 %v523_v28, %v1686_v53  ;;  %v635_v28 = vadd.f32 %v615_v26, %v586_v22 }
 0x170   : > { %v577_v16 = vsel %vm573_vm2, %v570_v59, %v572_v33  ;;  %v587_v37 = vadd.f32 %v576_v36, %v538_v54  ;;  %vm1060_vm2 = vcmask 1048448  }
 0x171   : > { %v588_v56 = vadd.f32 %v577_v16, %v539_v31  ;;  %v589_v1 = vadd.f32 %v572_v33, %v540_v0 }
 0x172   : > { %v636_v40 = vadd.f32 %v625_v38, %v587_v37 }
 0x176   : > { %v668_v44 = vpop.permute.xlu0 %667  ;;  %v762_v48 = vpop.permute.xlu2 %761 }
 0x177   : > { %v621_v41 = vpop.permute.xlu1 %620  ;;  %v674_v52 = vsel %vm671_vm4, %v666_v51, %v668_v44  ;;  %v771_v58 = vsel %vm769_vm6, %v760_v6, %v762_v48  ;;  %v821_v51 = vsel %vm818_vm7, %v813_v12, %v1826_v7 }
 0x178   : > { %v685_v43 = vadd.f32 %v674_v52, %v636_v40  ;;  %v626_v3 = vsel %vm622_vm3, %v1806_v17, %v621_v41  ;;  %v638_v4 = vadd.f32 %v621_v41, %v589_v1 }
 0x179   : > { %v637_v18 = vadd.f32 %v626_v3, %v588_v56 }
 0x17a   : > { %v734_v39 = vadd.f32 %v723_v15, %v685_v43 }
 0x17c   : > { %v783_v5 = vadd.f32 %v772_v57, %v734_v39 }
 0x17e   : > { %v664_v47 = vpop.permute.xlu0 %663  ;;  %v866_v34 = vpop.permute.xlu2 %865 }
 0x17f   : > { %v670_v45 = vpop.permute.xlu1 %669  ;;  %v673_v20 = vsel %vm671_vm4, %v662_v23, %v664_v47  ;;  %v832_v23 = vadd.f32 %v821_v51, %v783_v5  ;;  %v684_v13 = vadd.f32 %v664_v47, %v635_v28 }
 0x180   : > { %v683_v49 = vadd.f32 %v673_v20, %v634_v55  ;;  %v675_v12 = vsel %vm671_vm4, %v668_v44, %v670_v45  ;;  %v687_v14 = vadd.f32 %v670_v45, %v638_v4  ;;  %v871_v44 = vsel %vm867_vm8, %v1830_v24, %v866_v34 }
 0x181   : > { %v881_v21 = vadd.f32 %v870_v63, %v832_v23  ;;  %v686_v17 = vadd.f32 %v675_v12, %v637_v18  ;;  %v733_v38 = vadd.f32 %v713_v42, %v684_v13 }
 0x182   : > { %v732_v54 = vadd.f32 %v722_v50, %v683_v49 }
 0x183   : > { %v782_v47 = vadd.f32 %v762_v48, %v733_v38  ;;  %v932_v48 = vld [vmem:[%s1959_s6] sm:$0xff] }
 0x184   : > { %v781_v59 = vadd.f32 %v771_v58, %v732_v54 }
 0x186   : > { %v1847_v62 = vpop.permute.xlu0 %857 }
 0x187   : > { %v719_v61 = vpop.permute.xlu1 %718  ;;  %v868_v25 = vsel %vm867_vm8, %v856_v46, %v1847_v62 }
 0x188   : > { %v724_v53 = vsel %vm720_vm5, %v1814_v2, %v719_v61  ;;  %v736_v31 = vadd.f32 %v719_v61, %v687_v14  ;;  %v878_v60 = vadd.f32 %v868_v25, %v1823_v35 }
 0x189   : > { %v735_v32 = vadd.f32 %v724_v53, %v686_v17  ;;  %v1009_v17 = vpop.permute.xlu2 %1008 }
 0x18e   : > { %v768_v9 = vpop.permute.xlu0 %767 }
 0x18f   : > { %v894_v6 = vpop.permute.xlu1 %893  ;;  %v773_v30 = vsel %vm769_vm6, %v1817_v10, %v768_v9  ;;  %v785_v33 = vadd.f32 %v768_v9, %v736_v31 }
 0x190   : > { %v899_v19 = vadd.f32 %v894_v6, %v881_v21  ;;  %v784_v56 = vadd.f32 %v773_v30, %v735_v32 }
 0x192   : > { %v905_v27 = vadd.f32 3.0, %v899_v19 }
 0x194   : > { %v911_v29 = vmax.f32 %v905_v27, 0.0 }
 0x196   : > { %v917_v55 = vmin.f32 %v911_v29, 6.0  ;;  %v817_v36 = vpop.permute.xlu0 %816 }
 0x197   : > { %v889_v16 = vpop.permute.xlu1 %888  ;;  %v822_v26 = vsel %vm818_vm7, %v1826_v7, %v817_v36  ;;  %v834_v46 = vadd.f32 %v817_v36, %v785_v33 }
 0x198   : > { %v896_v2 = vadd.f32 %v889_v16, %v878_v60  ;;  %v923_v37 = vmul.f32 %v917_v55, %v899_v19  ;;  %v833_v40 = vadd.f32 %v822_v26, %v784_v56 }
 0x199   : > { %v883_v35 = vadd.f32 %v866_v34, %v834_v46 }
 0x19a   : > { %v929_v41 = vmul.f32 0.16666667, %v923_v37  ;;  %v902_v10 = vadd.f32 3.0, %v896_v2  ;;  %v882_v52 = vadd.f32 %v871_v44, %v833_v40 }
 0x19b   : > { %v901_v45 = vadd.f32 %v894_v6, %v883_v35 }
 0x19c   : > { %957 = vmatpush.msra.mxu3 %v929_v41  ;;  %v908_v43 = vmax.f32 %v902_v10, 0.0  ;;  %v900_v20 = vadd.f32 %v894_v6, %v882_v52 }
 0x19d   : > { %v907_v49 = vadd.f32 3.0, %v901_v45 }
 0x19e   : > { %v914_v15 = vmin.f32 %v908_v43, 6.0  ;;  %v860_v50 = vpop.permute.xlu0 %859  ;;  %v906_v57 = vadd.f32 3.0, %v900_v20 }
 0x19f   : > { %v811_v39 = vpop.permute.xlu1 %810  ;;  %v913_v24 = vmax.f32 %v907_v49, 0.0  ;;  %v869_v5 = vsel %vm867_vm8, %v1847_v62, %v860_v50 }
 0x1a0   : > { %v820_v7 = vsel %vm818_vm7, %v1819_v11, %v811_v39  ;;  %v831_v42 = vadd.f32 %v811_v39, %v782_v47  ;;  %v920_v54 = vmul.f32 %v914_v15, %v896_v2  ;;  %v912_v23 = vmax.f32 %v906_v57, 0.0 }
 0x1a1   : > { %v830_v58 = vadd.f32 %v820_v7, %v781_v59  ;;  %v919_v0 = vmin.f32 %v913_v24, 6.0 }
 0x1a2   : > { %v880_v61 = vadd.f32 %v860_v50, %v831_v42  ;;  %v926_v51 = vmul.f32 0.16666667, %v920_v54  ;;  %v918_v21 = vmin.f32 %v912_v23, 6.0 }
 0x1a3   : > { %v879_v63 = vadd.f32 %v869_v5, %v830_v58  ;;  %v925_v59 = vmul.f32 %v919_v0, %v901_v45 }
 0x1a4   : > { %v898_v11 = vadd.f32 %v889_v16, %v880_v61  ;;  %958 = vmatpush.msra.mxu3 %v926_v51  ;;  %v924_v3 = vmul.f32 %v918_v21, %v900_v20 }
 0x1a5   : > { %1201 = vmatmul.msk.f32.vlgmr.msra.gmra.mxu3 %vm939_vm9, %v932_v48  ;;  %v897_v1 = vadd.f32 %v889_v16, %v879_v63  ;;  %v931_v8 = vmul.f32 0.16666667, %v925_v59 }
 0x1a6   : > { %v904_v6 = vadd.f32 3.0, %v898_v11  ;;  %v930_v9 = vmul.f32 0.16666667, %v924_v3  ;;  %v1011_v55 = vpop.permute.xlu0 %1010 }
 0x1a7   : > { %v903_v62 = vadd.f32 3.0, %v897_v1  ;;  %997 = vmatpush.msrb.mxu0 %v931_v8  ;;  %v937_v25 = vpop.permute.xlu1 %936  ;;  %v1013_v56 = vsel %vm671_vm4, %v1009_v17, %v1011_v55 }
 0x1a8   : > { %v910_v19 = vmax.f32 %v904_v6, 0.0  ;;  %977 = vmatpush.msrb.mxu3 %v930_v9 }
 0x1a9   : > { %v909_v4 = vmax.f32 %v903_v62, 0.0 }
 0x1aa   : > { %v916_v12 = vmin.f32 %v910_v19, 6.0 }
 0x1ab   : > { %v915_v22 = vmin.f32 %v909_v4, 6.0 }
 0x1ac   : > { %v922_v18 = vmul.f32 %v916_v12, %v898_v11 }
 0x1ad   : > { %v921_v27 = vmul.f32 %v915_v22, %v897_v1 }
 0x1ae   : > { %v928_v14 = vmul.f32 0.16666667, %v922_v18 }
 0x1af   : > { %v927_v53 = vmul.f32 0.16666667, %v921_v27  ;;  %v1007_v28 = vpop.permute.xlu1 %1006 }
 0x1b0   : > { %998 = vmatpush.msrb.mxu0 %v928_v14  ;;  %v1012_v31 = vsel %vm671_vm4, %v1007_v28, %v1009_v17 }
 0x1b1   : > { %978 = vmatpush.msrb.mxu3 %v927_v53  ;;  %1203 = vmatmul.msk.f32.vlgmr.msrb.gmra.mxu0 %vm939_vm9, %v932_v48 }
 0x1b2   : > { %1202 = vmatmul.msk.f32.vlgmr.msrb.gmra.mxu3 %vm939_vm9, %v932_v48 }
 0x228   : > { %v960_v29 = vpop.f32.mrf.mxu3 }
 0x229   : > { %v961_v30 = vadd.f32 %v960_v29, %v937_v25 }
 0x22b   : > { %v1017_v13 = vadd.f32 %v1012_v31, %v961_v30 }
 0x22d   : > { %1032 = vrot.lane.b32.xlu1 %v1017_v13, %s1425_s21  ;;  %1027 = vrot.lane.b32.xlu0 %v1017_v13, %s1426_s22  ;;  %1020 = vst.msk [vmem:[%s1883_s23] sm:$0xff] %vm939_vm9, %v1017_v13  ;;  %s1433_s21 = smov 102   ;;  %s1434_s22 = smov 114  }
 0x22e   : > { %v1000_v32 = vpop.f32.mrf.mxu0 }
 0x22f   : > { %v1001_v60 = vadd.f32 %v1000_v32, %v937_v25 }
 0x231   : > { %v1019_v33 = vadd.f32 %v1011_v55, %v1001_v60 }
 0x233   : > { %1089 = vrot.lane.b32.xlu2 %v1019_v33, %s1427_s24 }
 0x235   : > { %v980_v16 = vpop.f32.mrf.mxu3  ;;  %1037 = vrot.lane.b32.xlu0 %v1017_v13, %s1428_s25  ;;  %s1435_s25 = smov 106  }
 0x236   : > { %v981_v34 = vadd.f32 %v980_v16, %v937_v25 }
 0x238   : > { %v1018_v2 = vadd.f32 %v1013_v56, %v981_v34 }
 0x23a   : > { %1062 = vrot.lane.b32.xlu1 %v1018_v2, %s1429_s26 }
 0x23b   : > { %1022 = vrot.lane.b32.xlu2 %v1017_v13, %s1422_s18  ;;  %s1436_s18 = smov 98  }
 0x23d   : > { %1047 = vrot.lane.b32.xlu0 %v1017_v13, %s1430_s12  ;;  %s1113_s12 = sshll.u32 %s1883_s23, 4  ;;  %s1114_s12 = int_to_ptr.vmem [resolvable:$true] %s1113_s12 }
 0x242   : > { %1078 = vrot.lane.b32.xlu1 %v1018_v2, %s1431_s13 }
 0x243   : > { %1042 = vrot.lane.b32.xlu2 %v1017_v13, %s1432_s20 }
 0x245   : > { %1070 = vrot.lane.b32.xlu0 %v1018_v2, %s1423_s19 }
 0x24a   : > { %1087 = vrot.lane.b32.xlu1 %v1018_v2, %s1427_s24 }
 0x24b   : > { %1066 = vrot.lane.b32.xlu2 %v1018_v2, %s1418_s10  ;;  %s1209_s10 = sshll.u32 %s1503_s9, 4  ;;  %s1100_s9 = scalar_lea.sflag [#allocation5], %s311_s17 }
 0x24c   : > { %s1111_s26 = scalar_lea.hbm %s1961_s8, %s1209_s10 }
 0x24d   : > { %1082 = vrot.lane.b32.xlu0 %v1018_v2, %s1433_s21  ;;  %s1115_s13 = sshll.u32 %s1111_s26, 4  ;;  %s1116_s13 = int_to_ptr.hbm [resolvable:$true] %s1115_s13 }
 0x24e   : > { %s1353_s20 = sshra.s32 %s1116_s13, 4  ;;  %s1354_s20 = int_to_ptr.hbm [resolvable:$true] %s1353_s20 }
 0x24f   : > { %s1355_s21 = scalar_lea.hbm %s1354_s20, 16  ;;  %p1360_p3 = scmp.lt.s32.totalorder %s1354_s20, %s1961_s8 }
 0x250   : > { %p1356_p0 = scmp.ne.s32.totalorder %s1354_s20, %s1355_s21 }
 0x252   : > { %1053 = vrot.lane.b32.xlu1 %v1017_v13, %s1434_s22  ;;  %p1357_p1 = pnand %p1356_p0, %p1520_p5 }
 0x253   : > { %1074 = vrot.lane.b32.xlu2 %v1018_v2, %s1435_s25 }
 0x254   : > { %p1358_p2 = pneg %p1357_p1 }
 0x255   : > { %1095 = vrot.lane.b32.xlu0 %v1019_v33, %s1436_s18  ;;  %s1359_s18 = scalar_lea.hbm %s1961_s8, 32 }
 0x256   : > { %p1361_p4 = scmp.lt.s32.totalorder %s1359_s18, %s1355_s21 }
 0x258   : > { %p1362_p7 = por %p1361_p4, %p1360_p3 }
 0x25a   : > { %p1363_p8 = pnand %p1362_p7, %p1358_p2 }
 0x25b   : > { %1055 = vrot.lane.b32.xlu2 %v1018_v2, %s1434_s22 }
 0x28d   : > { %v1090_v36 = vpop.permute.xlu2 %1089 }
 0x295   : > { %v1023_v37 = vpop.permute.xlu2 %1022 }
 0x296   : > { %1026 = vst.msk [vmem:[%s1883_s23] sm:$0xff] %vm1025_vm10, %v1023_v37 }
 0x29d   : > { %v1043_v38 = vpop.permute.xlu2 %1042 }
 0x29f   : > { %v1033_v26 = vpop.permute.xlu1 %1032  ;;  %v1028_v46 = vpop.permute.xlu0 %1027 }
 0x2a0   : > { %1031 = vst.msk [vmem:[%s1883_s23] sm:$0xff] %vm1030_vm11, %v1028_v46 }
 0x2a1   : > { %1036 = vst.msk [vmem:[%s1883_s23] sm:$0xff] %vm1035_vm12, %v1033_v26 }
 0x2a5   : > { %v1067_v10 = vpop.permute.xlu2 %1066 }
 0x2a7   : > { %v1038_v40 = vpop.permute.xlu0 %1037 }
 0x2a8   : > { %1041 = vst.msk [vmem:[%s1883_s23] sm:$0xff] %vm1040_vm13, %v1038_v40 }
 0x2a9   : > { %1046 = vst.msk [vmem:[%s1883_s23] sm:$0xff] %vm1045_vm14, %v1043_v38 }
 0x2ac   : > { %v1063_v41 = vpop.permute.xlu1 %1062 }
 0x2ad   : > { %1065 = vst.msk [vmem:[%s1883_s23 + $0x8] sm:$0xff] %vm939_vm9, %v1063_v41  ;;  %v1075_v43 = vpop.permute.xlu2 %1074 }
 0x2ae   : > { %1069 = vst.msk [vmem:[%s1883_s23 + $0x8] sm:$0xff] %vm1025_vm10, %v1067_v10 }
 0x2af   : > { %v1048_v44 = vpop.permute.xlu0 %1047 }
 0x2b0   : > { %1051 = vst.msk [vmem:[%s1883_s23] sm:$0xff] %vm1050_vm15, %v1048_v44 }
 0x2b4   : > { %v1079_v35 = vpop.permute.xlu1 %1078 }
 0x2b5   : > { %v1056_v20 = vpop.permute.xlu2 %1055 }
 0x2b7   : > { %v1071_v52 = vpop.permute.xlu0 %1070 }
 0x2b8   : > { %1073 = vst.msk [vmem:[%s1883_s23 + $0x8] sm:$0xff] %vm1030_vm11, %v1071_v52 }
 0x2b9   : > { %1077 = vst.msk [vmem:[%s1883_s23 + $0x8] sm:$0xff] %vm1035_vm12, %v1075_v43 }
 0x2ba   : > { %1081 = vst.msk [vmem:[%s1883_s23 + $0x8] sm:$0xff] %vm1040_vm13, %v1079_v35 }
 0x2bc   : > { %v1088_v45 = vpop.permute.xlu1 %1087 }
 0x2bd   : > { %v1092_v15 = vsel %vm1091_vm0, %v1088_v45, %v1090_v36 }
 0x2bf   : > { %v1083_v47 = vpop.permute.xlu0 %1082 }
 0x2c0   : > { %1085 = vst.msk [vmem:[%s1883_s23 + $0x8] sm:$0xff] %vm1045_vm14, %v1083_v47 }
 0x2c1   : > { %1094 = vst.msk [vmem:[%s1883_s23 + $0x8] sm:$0xff] %vm1050_vm15, %v1092_v15 }
 0x2c4   : > { %v1054_v39 = vpop.permute.xlu1 %1053 }
 0x2c5   : > { %v1058_v49 = vsel %vm1057_vm1, %v1054_v39, %v1056_v20 }
 0x2c6   : > { %1061 = vst.msk [vmem:[%s1883_s23] sm:$0xff] %vm1060_vm2, %v1058_v49 }
 0x2c7   : > { %v1096_v7 = vpop.permute.xlu0 %1095 }
 0x2c8   : > { %1098 = vst.msk [vmem:[%s1883_s23 + $0x8] sm:$0xff] %vm1060_vm2, %v1096_v7 }
 0x2c9   : > { %1366 = shalt.err (!%p1363_p8)
}
 0x2ca   : > { %1215 = dma.vmem_to_hbm [thread:$0]  (%p1520_p5), %s1114_s12, 256, %s1116_s13, %s1100_s9  }
 0x2cb PF: > { %p1227_p9 = scmp.ge.s32.totalorder %s1405_s30, 2  ;;  %s1127_s17 = sand.u32 1, %s1393_s27  }
 0x2cc   : > { %s1128_s23 = scalar_lea.sflag [#allocation5], %s1127_s17 }
 0x2cd   : > { %p1222_p10 = pnand %p1227_p9, %p1524_p6 }
 0x2cf   : > { %p1223_p11 = pneg %p1222_p10 }
 0x2d1   : > { %1388 = dma.done.wait (%p1223_p11), %s1128_s23, 256  }
 0x2d2   : > { %1390 = vsyncadd (%p1223_p11), %s1128_s23, 4294967040  ;;  %p19_p12 = scmp.ge.s32.totalorder %s1507_s11, 4   ;;  %s1964_s27 = smov %s1397_s28 }
 0x2d3   : > { %s1965_s28 = smov %s1401_s29  ;;  %s1966_s29 = smov %s1518_s14 }
 0x2d4   : > { %s1967_s30 = smov %s1507_s11  ;;  %21 = sbr.rel (!%p19_p12) target bundleno = 4 (0x4), region = 92 }
 0x2d9   :  { %1134 = vsyncpa [#allocation4], 1 }
 0x2da   :  { %1136 = vsyncpa [#allocation4 + $0x1], 1 }
 0x2db   :  { %1137 = vsyncpa [#allocation5], 1 }
 0x2dc   :  { %1139 = vsyncpa [#allocation5 + $0x1], 1 }

</bundles_post_ra>
